<compile_context>
chip_gen: v5e
topology: v5e:2x2
jax: 0.10.0
libtpu: 0.0.40
codegen_flags: <defaults>
</compile_context>

<pallas_src>
import jax
import jax.numpy as jnp
from jax import lax
from jax.experimental import pallas as pl
from jax.experimental.pallas import tpu as pltpu


_NEG_INF = -1e30  # bias for padded class columns -> exp() underflows to 0


def _round_up(x, m):
    return (x + m - 1) // m * m


def dan_kernel(ids_ref, len_ref, emb_ref, w1_ref, b1_ref, w2_ref, b2_ref, out_ref):
    """One batch tile of the fused DAN forward pass.

    ids_ref : (TB, S)   int32  token ids for this batch tile
    len_ref : (TB, 1)   f32    text length per row
    emb_ref : (Vp, Ep)  bf16   embedding table, resident across grid steps
    w1_ref  : (Ep, Hp)  bf16   linear1 weight (padded dims), resident
    b1_ref  : (1, Hp)   f32
    w2_ref  : (Hp, Cp)  bf16   linear2 weight (padded dims), resident
    b2_ref  : (1, Cp)   f32    padded entries hold -1e30 (masked out of softmax)
    out_ref : (TB, Cp)  f32    softmax probabilities (padded columns are 0)
    """
    TB, S = ids_ref.shape
    Vp = emb_ref.shape[0]

    # Per-example token histogram (TB, Vp).  Loop over the (small, static) S
    # axis so we never materialize a (TB, S, Vp) intermediate.
    ids = ids_ref[...]                                                  # (TB, S) int32
    iota_v = lax.broadcasted_iota(jnp.int32, (TB, Vp), 1)               # hoisted once
    counts = jnp.zeros((TB, Vp), jnp.float32)
    for s in range(S):                                                  # static unroll
        counts = counts + (ids[:, s:s + 1] == iota_v).astype(jnp.float32)

    # Fused gather + sequence-sum: one MXU matmul, f32 accumulation.
    # (counts are integers <= S, exactly representable in bf16 for S <= 256.)
    enc = jnp.dot(counts.astype(jnp.bfloat16), emb_ref[...],
                  preferred_element_type=jnp.float32)                   # (TB, Ep)

    # Length normalization: EUP reciprocal + multiply (no VALU divide).
    # (len == 0 would produce inf, matching the PyTorch module's divide.)
    enc = enc * pl.reciprocal(len_ref[...], approx=True)                # (TB, Ep)

    # Linear1 + ReLU (bf16 operands, f32 accumulation on the MXU).
    h = jnp.dot(enc.astype(jnp.bfloat16), w1_ref[...],
                preferred_element_type=jnp.float32) + b1_ref[...]       # (TB, Hp)
    h = jnp.maximum(h, 0.0)

    # Linear2.
    logits = jnp.dot(h.astype(jnp.bfloat16), w2_ref[...],
                     preferred_element_type=jnp.float32) + b2_ref[...]  # (TB, Cp)

    # Softmax over the (padded) class axis; padded logits are -1e30 -> exp == 0.
    m = jnp.max(logits, axis=-1, keepdims=True)
    e = jnp.exp(logits - m)
    denom = jnp.sum(e, axis=-1, keepdims=True)
    out_ref[...] = e * pl.reciprocal(denom, approx=True)


def _pick_batch_tile(batch):
    """Batch tile: multiple of 8, >= 2 grid steps when possible (v7x megacore)."""
    bp8 = _round_up(batch, 8)
    if bp8 >= 16:
        tb = _round_up(pl.cdiv(bp8, 2), 8)   # at least 2 tiles -> both v7x TCs busy
    else:
        tb = bp8
    return int(min(tb, 512))                 # keep per-tile intermediates modest


def _vmem_limit_bytes():
    """Generation-aware scoped-VMEM limit (v7x has only 64 MiB physical)."""
    kind = ""
    try:
        kind = jax.devices()[0].device_kind.lower()
    except Exception:
        pass
    if "v7" in kind:
        return 32 * 1024 * 1024
    return 64 * 1024 * 1024                  # v5e / v6e have 128 MiB physical


def dan_forward(input_text, text_len, emb_table, w1, b1, w2, b2, *, batch_tile=None):
    """input_text: (B, S) int32, text_len: (B,); returns (B, C) softmax probs (f32)."""
    B, S = input_text.shape
    V, E = emb_table.shape
    H = w1.shape[1]
    C = w2.shape[1]

    # Lane-dense padding of vocab / embedding / hidden / class dims.
    Vp = _round_up(V, 128)
    Ep = _round_up(E, 128)
    Hp = _round_up(H, 128)
    Cp = _round_up(C, 128)

    TB = batch_tile or _pick_batch_tile(B)
    assert TB % 8 == 0, "batch tile must be a multiple of 8 (sublane constraint)"
    n_tiles = pl.cdiv(B, TB)
    Bp = n_tiles * TB

    # Streamed per-tile inputs: just the ids and lengths (no (B,S,E) tensor).
    ids = jnp.pad(input_text.astype(jnp.int32), ((0, Bp - B), (0, 0)))     # pad rows -> token 0
    len_f = jnp.pad(text_len.astype(jnp.float32), (0, Bp - B),
                    constant_values=1.0).reshape(Bp, 1)                    # avoid 1/0 on pad rows

    # Resident (constant index_map) bf16 table / weights, f32 biases.
    emb_p = jnp.pad(emb_table, ((0, Vp - V), (0, Ep - E))).astype(jnp.bfloat16)   # (Vp, Ep)
    w1p = jnp.pad(w1, ((0, Ep - E), (0, Hp - H))).astype(jnp.bfloat16)            # (Ep, Hp)
    b1p = jnp.pad(b1.reshape(1, H).astype(jnp.float32), ((0, 0), (0, Hp - H)))
    w2p = jnp.pad(w2, ((0, Hp - H), (0, Cp - C))).astype(jnp.bfloat16)            # (Hp, Cp)
    b2p = jnp.pad(b2.reshape(1, C).astype(jnp.float32), ((0, 0), (0, Cp - C)),
                  constant_values=_NEG_INF)

    out_padded = pl.pallas_call(
        dan_kernel,
        out_shape=jax.ShapeDtypeStruct((Bp, Cp), jnp.float32),
        grid=(n_tiles,),
        in_specs=[
            pl.BlockSpec((TB, S), lambda i: (i, 0)),     # ids, streamed per batch tile
            pl.BlockSpec((TB, 1), lambda i: (i, 0)),     # lengths
            pl.BlockSpec((Vp, Ep), lambda i: (0, 0)),    # embedding table, resident
            pl.BlockSpec((Ep, Hp), lambda i: (0, 0)),    # weights resident across tiles
            pl.BlockSpec((1, Hp), lambda i: (0, 0)),
            pl.BlockSpec((Hp, Cp), lambda i: (0, 0)),
            pl.BlockSpec((1, Cp), lambda i: (0, 0)),
        ],
        out_specs=pl.BlockSpec((TB, Cp), lambda i: (i, 0)),
        compiler_params=pltpu.CompilerParams(
            dimension_semantics=("parallel",),           # batch tiles are independent
            vmem_limit_bytes=_vmem_limit_bytes(),
        ),
    )(ids, len_f, emb_p, w1p, b1p, w2p, b2p)

    return out_padded[:B, :C]


if __name__ == "__main__":
    # Small, deterministic configuration consistent with the module:
    vocab_size = 64
    emb_dim = 128          # stands in for word2vec's 300
    n_hidden_units = 96    # stands in for 200 (exercises the 128-lane padding path)
    n_classes = 8          # stands in for len(ans2idx) + 1
    batch = 16
    seq = 16

    key = jax.random.PRNGKey(0)
    k_emb, k_w1, k_b1, k_w2, k_b2, k_txt, k_len = jax.random.split(key, 7)

    # Deterministic "pretrained" embedding table (frozen in the reference model).
    emb_table = jax.random.normal(k_emb, (vocab_size, emb_dim), dtype=jnp.float32) * 0.1

    # Linear layers, stored as [in_dim, out_dim].
    w1 = jax.random.normal(k_w1, (emb_dim, n_hidden_units), dtype=jnp.float32) * 0.1
    b1 = jax.random.normal(k_b1, (1, n_hidden_units), dtype=jnp.float32) * 0.1
    w2 = jax.random.normal(k_w2, (n_hidden_units, n_classes), dtype=jnp.float32) * 0.1
    b2 = jax.random.normal(k_b2, (1, n_classes), dtype=jnp.float32) * 0.1

    # Example inputs: token ids and per-example text lengths.
    input_text = jax.random.randint(k_txt, (batch, seq), 0, vocab_size, dtype=jnp.int32)
    text_len = jax.random.randint(k_len, (batch,), 1, seq + 1, dtype=jnp.int32)

    out = dan_forward(input_text, text_len, emb_table, w1, b1, w2, b2, batch_tile=8)
    out = jax.block_until_ready(out)

    # Pure-JAX reference using the same bf16-stream / f32-accumulate recipe.
    te = jnp.take(emb_table.astype(jnp.bfloat16).astype(jnp.float32), input_text, axis=0)
    enc = te.sum(axis=1) / text_len.reshape(batch, 1).astype(jnp.float32)
    h = jnp.maximum(
        jnp.dot(enc.astype(jnp.bfloat16), w1.astype(jnp.bfloat16),
                preferred_element_type=jnp.float32) + b1, 0.0)
    logits = jnp.dot(h.astype(jnp.bfloat16), w2.astype(jnp.bfloat16),
                     preferred_element_type=jnp.float32) + b2
    ref = jax.nn.softmax(logits, axis=-1)

    assert out.shape == (batch, n_classes)
    err = jnp.abs(out - ref).max()
    # approx=True reciprocals (EUP) have ~2^-12 relative error -> loosened atol.
    assert jnp.allclose(out, ref, atol=2e-3), f"mismatch vs reference, max abs err {err}"

    print("KERNEL_OK")
</pallas_src>

<mosaic_0001>
module attributes {stable_mosaic.version = 11 : i64} {
  func.func @dan_kernel(%arg0: i32, %arg1: memref<8x16xi32, #tpu.memory_space<vmem>>, %arg2: memref<8x1xf32, #tpu.memory_space<vmem>>, %arg3: memref<128x128xbf16, #tpu.memory_space<vmem>>, %arg4: memref<128x128xbf16, #tpu.memory_space<vmem>>, %arg5: memref<1x128xf32, #tpu.memory_space<vmem>>, %arg6: memref<128x128xbf16, #tpu.memory_space<vmem>>, %arg7: memref<1x128xf32, #tpu.memory_space<vmem>>, %arg8: memref<8x128xf32, #tpu.memory_space<vmem>>) attributes {dimension_semantics = [#tpu.dimension_semantics<parallel>], iteration_bounds = array<i64: 2>, scalar_prefetch = 0 : i64, scratch_operands = 0 : i64, tpu.core_type = #tpu.core_type<tc>, window_params = [{transform_indices = @transform_0, window_bounds = array<i64: 8, 16>}, {transform_indices = @transform_1, window_bounds = array<i64: 8, 1>}, {pipeline_mode = #tpu.pipeline_mode<synchronous>, transform_indices = @transform_2, window_bounds = array<i64: 128, 128>}, {pipeline_mode = #tpu.pipeline_mode<synchronous>, transform_indices = @transform_3, window_bounds = array<i64: 128, 128>}, {pipeline_mode = #tpu.pipeline_mode<synchronous>, transform_indices = @transform_4, window_bounds = array<i64: 1, 128>}, {pipeline_mode = #tpu.pipeline_mode<synchronous>, transform_indices = @transform_5, window_bounds = array<i64: 128, 128>}, {pipeline_mode = #tpu.pipeline_mode<synchronous>, transform_indices = @transform_6, window_bounds = array<i64: 1, 128>}, {transform_indices = @transform_7, window_bounds = array<i64: 8, 128>}]} {
    %c0 = arith.constant 0 : index
    %c0_0 = arith.constant 0 : index
    %0 = vector.load %arg1[%c0, %c0_0] : memref<8x16xi32, #tpu.memory_space<vmem>>, vector<8x16xi32>
    %1 = tpu.iota {dimensions = array<i32: 1>} : vector<8x128xi32>
    %cst = arith.constant 0.000000e+00 : f32
    %2 = vector.broadcast %cst : f32 to vector<8x128xf32>
    %3 = vector.extract_strided_slice %0 {offsets = [0, 0], sizes = [8, 1], strides = [1, 1]} : vector<8x16xi32> to vector<8x1xi32>
    %4 = vector.broadcast %3 : vector<8x1xi32> to vector<8x128xi32>
    %5 = arith.cmpi eq, %4, %1 : vector<8x128xi32>
    %6 = arith.extui %5 : vector<8x128xi1> to vector<8x128xi32>
    %7 = arith.sitofp %6 : vector<8x128xi32> to vector<8x128xf32>
    %8 = arith.addf %2, %7 : vector<8x128xf32>
    %9 = vector.extract_strided_slice %0 {offsets = [0, 1], sizes = [8, 1], strides = [1, 1]} : vector<8x16xi32> to vector<8x1xi32>
    %10 = vector.broadcast %9 : vector<8x1xi32> to vector<8x128xi32>
    %11 = arith.cmpi eq, %10, %1 : vector<8x128xi32>
    %12 = arith.extui %11 : vector<8x128xi1> to vector<8x128xi32>
    %13 = arith.sitofp %12 : vector<8x128xi32> to vector<8x128xf32>
    %14 = arith.addf %8, %13 : vector<8x128xf32>
    %15 = vector.extract_strided_slice %0 {offsets = [0, 2], sizes = [8, 1], strides = [1, 1]} : vector<8x16xi32> to vector<8x1xi32>
    %16 = vector.broadcast %15 : vector<8x1xi32> to vector<8x128xi32>
    %17 = arith.cmpi eq, %16, %1 : vector<8x128xi32>
    %18 = arith.extui %17 : vector<8x128xi1> to vector<8x128xi32>
    %19 = arith.sitofp %18 : vector<8x128xi32> to vector<8x128xf32>
    %20 = arith.addf %14, %19 : vector<8x128xf32>
    %21 = vector.extract_strided_slice %0 {offsets = [0, 3], sizes = [8, 1], strides = [1, 1]} : vector<8x16xi32> to vector<8x1xi32>
    %22 = vector.broadcast %21 : vector<8x1xi32> to vector<8x128xi32>
    %23 = arith.cmpi eq, %22, %1 : vector<8x128xi32>
    %24 = arith.extui %23 : vector<8x128xi1> to vector<8x128xi32>
    %25 = arith.sitofp %24 : vector<8x128xi32> to vector<8x128xf32>
    %26 = arith.addf %20, %25 : vector<8x128xf32>
    %27 = vector.extract_strided_slice %0 {offsets = [0, 4], sizes = [8, 1], strides = [1, 1]} : vector<8x16xi32> to vector<8x1xi32>
    %28 = vector.broadcast %27 : vector<8x1xi32> to vector<8x128xi32>
    %29 = arith.cmpi eq, %28, %1 : vector<8x128xi32>
    %30 = arith.extui %29 : vector<8x128xi1> to vector<8x128xi32>
    %31 = arith.sitofp %30 : vector<8x128xi32> to vector<8x128xf32>
    %32 = arith.addf %26, %31 : vector<8x128xf32>
    %33 = vector.extract_strided_slice %0 {offsets = [0, 5], sizes = [8, 1], strides = [1, 1]} : vector<8x16xi32> to vector<8x1xi32>
    %34 = vector.broadcast %33 : vector<8x1xi32> to vector<8x128xi32>
    %35 = arith.cmpi eq, %34, %1 : vector<8x128xi32>
    %36 = arith.extui %35 : vector<8x128xi1> to vector<8x128xi32>
    %37 = arith.sitofp %36 : vector<8x128xi32> to vector<8x128xf32>
    %38 = arith.addf %32, %37 : vector<8x128xf32>
    %39 = vector.extract_strided_slice %0 {offsets = [0, 6], sizes = [8, 1], strides = [1, 1]} : vector<8x16xi32> to vector<8x1xi32>
    %40 = vector.broadcast %39 : vector<8x1xi32> to vector<8x128xi32>
    %41 = arith.cmpi eq, %40, %1 : vector<8x128xi32>
    %42 = arith.extui %41 : vector<8x128xi1> to vector<8x128xi32>
    %43 = arith.sitofp %42 : vector<8x128xi32> to vector<8x128xf32>
    %44 = arith.addf %38, %43 : vector<8x128xf32>
    %45 = vector.extract_strided_slice %0 {offsets = [0, 7], sizes = [8, 1], strides = [1, 1]} : vector<8x16xi32> to vector<8x1xi32>
    %46 = vector.broadcast %45 : vector<8x1xi32> to vector<8x128xi32>
    %47 = arith.cmpi eq, %46, %1 : vector<8x128xi32>
    %48 = arith.extui %47 : vector<8x128xi1> to vector<8x128xi32>
    %49 = arith.sitofp %48 : vector<8x128xi32> to vector<8x128xf32>
    %50 = arith.addf %44, %49 : vector<8x128xf32>
    %51 = vector.extract_strided_slice %0 {offsets = [0, 8], sizes = [8, 1], strides = [1, 1]} : vector<8x16xi32> to vector<8x1xi32>
    %52 = vector.broadcast %51 : vector<8x1xi32> to vector<8x128xi32>
    %53 = arith.cmpi eq, %52, %1 : vector<8x128xi32>
    %54 = arith.extui %53 : vector<8x128xi1> to vector<8x128xi32>
    %55 = arith.sitofp %54 : vector<8x128xi32> to vector<8x128xf32>
    %56 = arith.addf %50, %55 : vector<8x128xf32>
    %57 = vector.extract_strided_slice %0 {offsets = [0, 9], sizes = [8, 1], strides = [1, 1]} : vector<8x16xi32> to vector<8x1xi32>
    %58 = vector.broadcast %57 : vector<8x1xi32> to vector<8x128xi32>
    %59 = arith.cmpi eq, %58, %1 : vector<8x128xi32>
    %60 = arith.extui %59 : vector<8x128xi1> to vector<8x128xi32>
    %61 = arith.sitofp %60 : vector<8x128xi32> to vector<8x128xf32>
    %62 = arith.addf %56, %61 : vector<8x128xf32>
    %63 = vector.extract_strided_slice %0 {offsets = [0, 10], sizes = [8, 1], strides = [1, 1]} : vector<8x16xi32> to vector<8x1xi32>
    %64 = vector.broadcast %63 : vector<8x1xi32> to vector<8x128xi32>
    %65 = arith.cmpi eq, %64, %1 : vector<8x128xi32>
    %66 = arith.extui %65 : vector<8x128xi1> to vector<8x128xi32>
    %67 = arith.sitofp %66 : vector<8x128xi32> to vector<8x128xf32>
    %68 = arith.addf %62, %67 : vector<8x128xf32>
    %69 = vector.extract_strided_slice %0 {offsets = [0, 11], sizes = [8, 1], strides = [1, 1]} : vector<8x16xi32> to vector<8x1xi32>
    %70 = vector.broadcast %69 : vector<8x1xi32> to vector<8x128xi32>
    %71 = arith.cmpi eq, %70, %1 : vector<8x128xi32>
    %72 = arith.extui %71 : vector<8x128xi1> to vector<8x128xi32>
    %73 = arith.sitofp %72 : vector<8x128xi32> to vector<8x128xf32>
    %74 = arith.addf %68, %73 : vector<8x128xf32>
    %75 = vector.extract_strided_slice %0 {offsets = [0, 12], sizes = [8, 1], strides = [1, 1]} : vector<8x16xi32> to vector<8x1xi32>
    %76 = vector.broadcast %75 : vector<8x1xi32> to vector<8x128xi32>
    %77 = arith.cmpi eq, %76, %1 : vector<8x128xi32>
    %78 = arith.extui %77 : vector<8x128xi1> to vector<8x128xi32>
    %79 = arith.sitofp %78 : vector<8x128xi32> to vector<8x128xf32>
    %80 = arith.addf %74, %79 : vector<8x128xf32>
    %81 = vector.extract_strided_slice %0 {offsets = [0, 13], sizes = [8, 1], strides = [1, 1]} : vector<8x16xi32> to vector<8x1xi32>
    %82 = vector.broadcast %81 : vector<8x1xi32> to vector<8x128xi32>
    %83 = arith.cmpi eq, %82, %1 : vector<8x128xi32>
    %84 = arith.extui %83 : vector<8x128xi1> to vector<8x128xi32>
    %85 = arith.sitofp %84 : vector<8x128xi32> to vector<8x128xf32>
    %86 = arith.addf %80, %85 : vector<8x128xf32>
    %87 = vector.extract_strided_slice %0 {offsets = [0, 14], sizes = [8, 1], strides = [1, 1]} : vector<8x16xi32> to vector<8x1xi32>
    %88 = vector.broadcast %87 : vector<8x1xi32> to vector<8x128xi32>
    %89 = arith.cmpi eq, %88, %1 : vector<8x128xi32>
    %90 = arith.extui %89 : vector<8x128xi1> to vector<8x128xi32>
    %91 = arith.sitofp %90 : vector<8x128xi32> to vector<8x128xf32>
    %92 = arith.addf %86, %91 : vector<8x128xf32>
    %93 = vector.extract_strided_slice %0 {offsets = [0, 15], sizes = [8, 1], strides = [1, 1]} : vector<8x16xi32> to vector<8x1xi32>
    %94 = vector.broadcast %93 : vector<8x1xi32> to vector<8x128xi32>
    %95 = arith.cmpi eq, %94, %1 : vector<8x128xi32>
    %96 = arith.extui %95 : vector<8x128xi1> to vector<8x128xi32>
    %97 = arith.sitofp %96 : vector<8x128xi32> to vector<8x128xf32>
    %98 = arith.addf %92, %97 : vector<8x128xf32>
    %99 = arith.truncf %98 : vector<8x128xf32> to vector<8x128xbf16>
    %c0_1 = arith.constant 0 : index
    %c0_2 = arith.constant 0 : index
    %100 = vector.load %arg3[%c0_1, %c0_2] : memref<128x128xbf16, #tpu.memory_space<vmem>>, vector<128x128xbf16>
    %cst_3 = arith.constant dense<0.000000e+00> : vector<8x128xf32>
    %101 = tpu.matmul %99, %100, %cst_3 {dimension_numbers = #tpu.dot_dimension_numbers<[1], [0], [0], [1], [0, 0, 1, 1], [], []>} : vector<8x128xbf16>, vector<128x128xbf16>, vector<8x128xf32> -> vector<8x128xf32>
    %c0_4 = arith.constant 0 : index
    %c0_5 = arith.constant 0 : index
    %102 = vector.load %arg2[%c0_4, %c0_5] : memref<8x1xf32, #tpu.memory_space<vmem>>, vector<8x1xf32>
    %103 = tpu.reciprocal %102 {approx = true} : vector<8x1xf32> -> vector<8x1xf32>
    %104 = vector.broadcast %103 : vector<8x1xf32> to vector<8x128xf32>
    %105 = arith.mulf %101, %104 : vector<8x128xf32>
    %106 = arith.truncf %105 : vector<8x128xf32> to vector<8x128xbf16>
    %c0_6 = arith.constant 0 : index
    %c0_7 = arith.constant 0 : index
    %107 = vector.load %arg4[%c0_6, %c0_7] : memref<128x128xbf16, #tpu.memory_space<vmem>>, vector<128x128xbf16>
    %cst_8 = arith.constant dense<0.000000e+00> : vector<8x128xf32>
    %108 = tpu.matmul %106, %107, %cst_8 {dimension_numbers = #tpu.dot_dimension_numbers<[1], [0], [0], [1], [0, 0, 1, 1], [], []>} : vector<8x128xbf16>, vector<128x128xbf16>, vector<8x128xf32> -> vector<8x128xf32>
    %c0_9 = arith.constant 0 : index
    %c0_10 = arith.constant 0 : index
    %109 = vector.load %arg5[%c0_9, %c0_10] : memref<1x128xf32, #tpu.memory_space<vmem>>, vector<1x128xf32>
    %110 = vector.broadcast %109 : vector<1x128xf32> to vector<8x128xf32>
    %111 = arith.addf %108, %110 : vector<8x128xf32>
    %cst_11 = arith.constant 0.000000e+00 : f32
    %112 = vector.broadcast %cst_11 : f32 to vector<8x128xf32>
    %113 = arith.maximumf %111, %112 : vector<8x128xf32>
    %114 = arith.truncf %113 : vector<8x128xf32> to vector<8x128xbf16>
    %c0_12 = arith.constant 0 : index
    %c0_13 = arith.constant 0 : index
    %115 = vector.load %arg6[%c0_12, %c0_13] : memref<128x128xbf16, #tpu.memory_space<vmem>>, vector<128x128xbf16>
    %cst_14 = arith.constant dense<0.000000e+00> : vector<8x128xf32>
    %116 = tpu.matmul %114, %115, %cst_14 {dimension_numbers = #tpu.dot_dimension_numbers<[1], [0], [0], [1], [0, 0, 1, 1], [], []>} : vector<8x128xbf16>, vector<128x128xbf16>, vector<8x128xf32> -> vector<8x128xf32>
    %c0_15 = arith.constant 0 : index
    %c0_16 = arith.constant 0 : index
    %117 = vector.load %arg7[%c0_15, %c0_16] : memref<1x128xf32, #tpu.memory_space<vmem>>, vector<1x128xf32>
    %118 = vector.broadcast %117 : vector<1x128xf32> to vector<8x128xf32>
    %119 = arith.addf %116, %118 : vector<8x128xf32>
    %cst_17 = arith.constant dense<0xFF800000> : vector<8xf32>
    %120 = vector.multi_reduction <maximumf>, %119, %cst_17 [1] : vector<8x128xf32> to vector<8xf32>
    %121 = vector.shape_cast %120 : vector<8xf32> to vector<8x1xf32>
    %122 = vector.broadcast %121 : vector<8x1xf32> to vector<8x128xf32>
    %123 = arith.subf %119, %122 : vector<8x128xf32>
    %124 = math.exp %123 : vector<8x128xf32>
    %cst_18 = arith.constant dense<0.000000e+00> : vector<8xf32>
    %125 = vector.multi_reduction <add>, %124, %cst_18 [1] : vector<8x128xf32> to vector<8xf32>
    %126 = vector.shape_cast %125 : vector<8xf32> to vector<8x1xf32>
    %127 = tpu.reciprocal %126 {approx = true} : vector<8x1xf32> -> vector<8x1xf32>
    %128 = vector.broadcast %127 : vector<8x1xf32> to vector<8x128xf32>
    %129 = arith.mulf %124, %128 : vector<8x128xf32>
    %c0_19 = arith.constant 0 : index
    %c0_20 = arith.constant 0 : index
    %130 = vector.load %arg8[%c0_19, %c0_20] : memref<8x128xf32, #tpu.memory_space<vmem>>, vector<8x128xf32>
    tpu.vector_store %arg8[%c0_19, %c0_20], %129 {strides = array<i32>} : memref<8x128xf32, #tpu.memory_space<vmem>>, vector<8x128xf32>,
    return
  }
  func.func @transform_0(%arg0: i32) -> (i32, i32) {
    %c0_i32 = arith.constant 0 : i32
    %c0_i32_0 = arith.constant 0 : i32
    return %arg0, %c0_i32 : i32, i32
  }
  func.func @transform_1(%arg0: i32) -> (i32, i32) {
    %c0_i32 = arith.constant 0 : i32
    %c0_i32_0 = arith.constant 0 : i32
    return %arg0, %c0_i32 : i32, i32
  }
  func.func @transform_2(%arg0: i32) -> (i32, i32) {
    %c0_i32 = arith.constant 0 : i32
    %c0_i32_0 = arith.constant 0 : i32
    %c0_i32_1 = arith.constant 0 : i32
    return %c0_i32, %c0_i32_0 : i32, i32
  }
  func.func @transform_3(%arg0: i32) -> (i32, i32) {
    %c0_i32 = arith.constant 0 : i32
    %c0_i32_0 = arith.constant 0 : i32
    %c0_i32_1 = arith.constant 0 : i32
    return %c0_i32, %c0_i32_0 : i32, i32
  }
  func.func @transform_4(%arg0: i32) -> (i32, i32) {
    %c0_i32 = arith.constant 0 : i32
    %c0_i32_0 = arith.constant 0 : i32
    %c0_i32_1 = arith.constant 0 : i32
    return %c0_i32, %c0_i32_0 : i32, i32
  }
  func.func @transform_5(%arg0: i32) -> (i32, i32) {
    %c0_i32 = arith.constant 0 : i32
    %c0_i32_0 = arith.constant 0 : i32
    %c0_i32_1 = arith.constant 0 : i32
    return %c0_i32, %c0_i32_0 : i32, i32
  }
  func.func @transform_6(%arg0: i32) -> (i32, i32) {
    %c0_i32 = arith.constant 0 : i32
    %c0_i32_0 = arith.constant 0 : i32
    %c0_i32_1 = arith.constant 0 : i32
    return %c0_i32, %c0_i32_0 : i32, i32
  }
  func.func @transform_7(%arg0: i32) -> (i32, i32) {
    %c0_i32 = arith.constant 0 : i32
    %c0_i32_0 = arith.constant 0 : i32
    return %arg0, %c0_i32 : i32, i32
  }
}

</mosaic_0001>

<bundles_post_ra>
// kernel: tpu_custom_call.1
= control target key start
LH: loop header
LB: loop body
LE: loop exit
PB: predicated region body
PF: predicated region fallthrough
CT: control target
= control target key end

     0   :  { %s1500_s0 = inlined_call_operand.vmem [shape: s32[16,16], index: 0, kind: input, shape index: {}]   ;;  %s1501_s1 = inlined_call_operand.vmem [shape: f32[16,1], index: 1, kind: input, shape index: {}]   ;;  %s1502_s2 = inlined_call_operand.hbm [shape: bf16[128,128], index: 2, kind: input, shape index: {}]   ;;  %s1503_s3 = inlined_call_operand.hbm [shape: bf16[128,128], index: 3, kind: input, shape index: {}]   ;;  %s1504_s4 = inlined_call_operand.vmem [shape: f32[1,128], index: 4, kind: input, shape index: {}]   ;;  %s1505_s5 = inlined_call_operand.hbm [shape: bf16[128,128], index: 5, kind: input, shape index: {}]   ;;  %s1506_s6 = inlined_call_operand.vmem [shape: f32[1,128], index: 6, kind: input, shape index: {}]   ;;  %s1507_s7 = inlined_call_operand.hbm [shape: f32[16,128], index: 7, kind: output, shape index: {}]  }
   0x1   :  { %1508 = sst [smem:[#allocation12_spill]] %s1502_s2 }
   0x2   :  { %12 = vsyncpa [#allocation3], 0 }
   0x3   :  { %13 = vsyncpa [#allocation6], 0 }
   0x4   :  { %14 = vsyncpa [#allocation4], 0 }
   0x5   :  { %16 = vsyncpa [#allocation4 + $0x1], 0  ;;  %s1327_s24 = smov 0   ;;  %s1329_s25 = smov 0  }
   0x6   :  { %s1331_s26 = smov 0   ;;  %s1333_s27 = smov 0  }
   0x7 LB: > { %s1348_s28 = sadd.s32 4294967295, %s1263_s27   ;;  %s835_s29 = sadd.s32 4294967294, %s1263_s27   ;;  %s1263_s27 = sphi %s1333_s27, %s1517_s27   ;;  %s1259_s26 = sphi %s1331_s26, %s1516_s26   ;;  %s1255_s25 = sphi %s1329_s25, %s1515_s25   ;;  %s1251_s24 = sphi %s1327_s24, %s1514_s24  }
   0x8   : > { %s1352_s30 = sadd.s32 1, %s1263_s27   ;;  %s186_s8 = sadd.s32 1, %s1259_s26 }
   0x9   : > { %s183_s9 = ssub.s32 %s1263_s27, %s1352_s30  ;;  %p196_p0 = scmp.ne.s32.totalorder %s1259_s26, %s1255_s25 }
   0xa   : > { %p184_p1 = scmp.eq.s32.totalorder %s183_s9, 0  ;;  %p197_p2 = scmp.eq.s32.totalorder %s1348_s28, 1 }
   0xb   : > { %p202_p3 = scmp.ne.s32.totalorder %s1255_s25, %s1251_s24  ;;  %p203_p4 = scmp.eq.s32.totalorder %s835_s29, 1 }
   0xc   : > { %s1363_s10 = scalar_select %p184_p1, %s1259_s26, %s186_s8  }
   0xd   : > { %p1365_p5 = por %p197_p2, %p196_p0  ;;  %p1369_p6 = por %p203_p4, %p202_p3 }
   0xe   : > { %p836_p7 = scmp.ge.s32.totalorder %s1263_s27, 1  ;;  %p210_p8 = scmp.lt.s32.totalorder %s1263_s27, 3 }
   0xf   : > { %p1016_p9 = scmp.eq.s32.totalorder %s1348_s28, 0  ;;  %s235_s16 = sshll.u32 %s1503_s3, 4  ;;  %s236_s16 = int_to_ptr.hbm [resolvable:$true] %s235_s16 }
  0x10   : > { %p1376_p10 = pnand %p836_p7, %p210_p8  ;;  %s1512_s2 = sld [smem:[#allocation12_spill]] }
  0x11   : > { %s1265_s21 = smov [#allocation5]   ;;  %s1266_s23 = smov 64  }
  0x12   : > { %p1002_p11 = pneg %p1376_p10  ;;  %s237_s22 = sshll.u32 %s1265_s21, 4  ;;  %s238_s22 = int_to_ptr.vmem [resolvable:$true] %s237_s22 }
  0x13   : > { %s1267_s29 = smov 4   ;;  %s1268_s8 = smov [#allocation2]  }
  0x14   : > { %p1390_p12 = pnand %p1016_p9, %p1002_p11  ;;  %s223_s9 = sshll.u32 %s1268_s8, 4  ;;  %s224_s9 = int_to_ptr.vmem [resolvable:$true] %s223_s9 }
  0x15   : > { %s252_s17 = sshll.u32 %s1505_s5, 4  ;;  %s1269_s18 = smov [#allocation7]   ;;  %s253_s17 = int_to_ptr.hbm [resolvable:$true] %s252_s17 }
  0x16   : > { %s221_s19 = sshll.u32 %s1512_s2, 4  ;;  %s254_s2 = sshll.u32 %s1269_s18, 4  ;;  %s222_s19 = int_to_ptr.hbm [resolvable:$true] %s221_s19  ;;  %s255_s2 = int_to_ptr.vmem [resolvable:$true] %s254_s2 }
  0x17   : > { %1008 = dma.hbm_to_vmem [thread:$0]  (!%p1390_p12), %s236_s16, 1024, %s238_s22, [#allocation6], %s1266_s23, %s1266_s23, %s1267_s29  }
  0x18   : > { %1005 = dma.hbm_to_vmem [thread:$0]  (!%p1390_p12), %s222_s19, 1024, %s224_s9, [#allocation3], %s1266_s23, %s1266_s23, %s1267_s29  }
  0x19   : > { %1011 = dma.hbm_to_vmem [thread:$0]  (!%p1390_p12), %s253_s17, 1024, %s255_s2, [#allocation6], %s1266_s23, %s1266_s23, %s1267_s29  }
  0x1a   : > { %287 = sbr.rel (%p1376_p10) target bundleno = 860 (0x35c), region = 48 }
  0x1f   : > { %1238 = dma.done.wait (%p1016_p9), [#allocation3], 1024  }
  0x20   : > { %1240 = vsyncadd (%p1016_p9), [#allocation3], 4294966272 }
  0x21   : > { %1242 = dma.done.wait (%p1016_p9), [#allocation6], 2048  }
  0x22   : > { %1244 = vsyncadd (%p1016_p9), [#allocation6], 4294965248  ;;  %p333_p13 = scmp.lt.s32.totalorder %s1348_s28, 1  ;;  %v1270_v0 = vmov 2   ;;  %v1271_v1 = vmov 0   ;;  %v1272_v2 = vmov 4   ;;  %v342_v21 = vlaneseq }
  0x23   : > { %1079 = vset.pattern.permute.xlu1 %v1270_v0  ;;  %1077 = vset.pattern.permute.xlu0 %v1271_v1  ;;  %v1273_v4 = vmov 3   ;;  %v1274_v5 = vmov 1   ;;  %v1275_v6 = vmov 5   ;;  %v1276_v7 = vmov 6   ;;  %v971_v17 = vld [vmem:[#allocation2 + $0x38] sm:$0xff]  ;;  %v970_v19 = vld [vmem:[#allocation2 + $0x30] sm:$0xff] }
  0x24   : > { %s1415_s2 = scalar_select %p333_p13, %s1348_s28, 1  ;;  %1081 = vset.pattern.permute.xlu2 %v1272_v2  ;;  %v1277_v8 = vmov 8   ;;  %v1278_v9 = vmov 7   ;;  %v1279_v10 = vmov 9   ;;  %v1280_v11 = vmov 13   ;;  %521 = vmatpush.bf16.msra.mxu0 %v971_v17  ;;  %v969_v20 = vld [vmem:[#allocation2 + $0x28] sm:$0xff] }
  0x25   : > { %v1281_v12 = vmov 10   ;;  %v1282_v13 = vmov 11   ;;  %v1283_v14 = vmov 12   ;;  %v1284_v15 = vmov 14   ;;  %v968_v24 = vld [vmem:[#allocation2 + $0x20] sm:$0xff]  ;;  %v967_v27 = vld [vmem:[#allocation2 + $0x18] sm:$0xff] }
  0x26   : > { %s846_s13 = sshll.u32 %s1415_s2, 3  ;;  %v1285_v16 = vmov 15   ;;  %v1423_v26 = vand.u32 127, %v342_v21  ;;  %v1286_v28 = vmov 0.0   ;;  %v966_v32 = vld [vmem:[#allocation2 + $0x10] sm:$0xff]  ;;  %v965_v37 = vld [vmem:[#allocation2 + $0x8] sm:$0xff] }
  0x27   : > { %s336_s20 = scalar_lea.vmem %s1500_s0, %s846_s13  ;;  %v964_v41 = vld [vmem:[#allocation2] sm:$0xff]  ;;  %s340_s23 = scalar_lea.vmem %s1501_s1, %s846_s13  ;;  %v979_v51 = vld [vmem:[#allocation5 + $0x38] sm:$0xff]  ;;  %v978_v54 = vld [vmem:[#allocation5 + $0x30] sm:$0xff] }
  0x28   : > { %v341_v3 = vld [vmem:[%s336_s20] sm:$0xff]  ;;  %522 = vmatpush.bf16.msra.mxu0 %v970_v19  ;;  %611 = vmatpush.bf16.msra.mxu1 %v979_v51  ;;  %v977_v58 = vld [vmem:[#allocation5 + $0x28] sm:$0xff]  ;;  %s330_s15 = sand.u32 1, %s1255_s25   ;;  %s961_s18 = sshll.u32 %s1348_s28, 3 }
  0x29   : > { %359 = vperm.xlu1 %1079, %v341_v3   ;;  %345 = vperm.xlu0 %1077, %v341_v3   ;;  %v534_v50 = vld [vmem:[%s340_s23] sm:$0xff]  ;;  %s845_s17 = sshll.u32 %s330_s15, 3  ;;  %s728_s16 = scalar_lea.hbm %s1507_s7, %s961_s18 }
  0x2a   : > { %373 = vperm.xlu2 %1081, %v341_v3   ;;  %1097 = vrcp.f32 %v534_v50  ;;  %v976_v63 = vld [vmem:[#allocation5 + $0x20] sm:$0xff]  ;;  %s332_s19 = scalar_lea.vmem [#allocation8], %s845_s17  ;;  %s732_s21 = sshll.u32 %s728_s16, 4  ;;  %s733_s21 = int_to_ptr.hbm [resolvable:$true] %s732_s21 }
  0x2b   : > { %v972_v21 = vld [vmem:[#allocation5] sm:$0xff]  ;;  %s730_s20 = sshll.u32 %s332_s19, 4  ;;  %s718_s22 = scalar_lea.sflag [#allocation4], %s330_s15  ;;  %s731_s20 = int_to_ptr.vmem [resolvable:$true] %s730_s20 }
  0x2c   : > { %523 = vmatpush.bf16.msra.mxu0 %v969_v20  ;;  %612 = vmatpush.bf16.msra.mxu1 %v978_v54  ;;  %s1207_s23 = sshra.s32 %s733_s21, 4  ;;  %s1213_s9 = scalar_lea.hbm %s1507_s7, 16  ;;  %s1208_s23 = int_to_ptr.hbm [resolvable:$true] %s1207_s23 }
  0x2d   : > { %s1209_s29 = scalar_lea.hbm %s1208_s23, 8  ;;  %p1214_p3 = scmp.lt.s32.totalorder %s1208_s23, %s1507_s7 }
  0x2e   : > { %p1210_p0 = scmp.ne.s32.totalorder %s1208_s23, %s1209_s29  ;;  %p1215_p4 = scmp.lt.s32.totalorder %s1213_s9, %s1209_s29 }
  0x30   : > { %524 = vmatpush.bf16.msra.mxu0 %v968_v24  ;;  %v1098_v59 = vpop.eup %1097  ;;  %613 = vmatpush.bf16.msra.mxu1 %v977_v58  ;;  %v985_v24 = vld [vmem:[#allocation7 + $0x28] sm:$0xff]  ;;  %p1211_p1 = pnand %p1210_p0, %p1365_p5  ;;  %p1216_p7 = por %p1215_p4, %p1214_p3 }
  0x31   : > { %1080 = vset.pattern.permute.xlu1 %v1273_v4  ;;  %1078 = vset.pattern.permute.xlu0 %v1274_v5 }
  0x32   : > { %366 = vperm.xlu1 %1080, %v341_v3   ;;  %352 = vperm.xlu0 %1078, %v341_v3   ;;  %p1212_p2 = pneg %p1211_p1 }
  0x33   : > { %1082 = vset.pattern.permute.xlu2 %v1275_v6 }
  0x34   : > { %380 = vperm.xlu2 %1082, %v341_v3   ;;  %525 = vmatpush.bf16.msra.mxu0 %v967_v27  ;;  %v982_v27 = vld [vmem:[#allocation7 + $0x10] sm:$0xff]  ;;  %p1217_p8 = pnand %p1216_p7, %p1212_p2 }
  0x35   : > { %614 = vmatpush.bf16.msra.mxu1 %v976_v63 }
  0x38   : > { %526 = vmatpush.bf16.msra.mxu0 %v966_v32 }
  0x3a   : > { %1083 = vset.pattern.permute.xlu1 %v1276_v7  ;;  %1085 = vset.pattern.permute.xlu0 %v1277_v8 }
  0x3b   : > { %387 = vperm.xlu1 %1083, %v341_v3   ;;  %401 = vperm.xlu0 %1085, %v341_v3  }
  0x3c   : > { %1084 = vset.pattern.permute.xlu2 %v1278_v9  ;;  %527 = vmatpush.bf16.msra.mxu0 %v965_v37  ;;  %v974_v9 = vld [vmem:[#allocation5 + $0x10] sm:$0xff] }
  0x3d   : > { %394 = vperm.xlu2 %1084, %v341_v3  }
  0x40   : > { %528 = vmatpush.bf16.msra.mxu0 %v964_v41  ;;  %v1096_v41 = vld [vmem:[%s1506_s6] ss:$0 sm:$0xff] }
  0x43   : > { %1086 = vset.pattern.permute.xlu1 %v1279_v10  ;;  %1090 = vset.pattern.permute.xlu0 %v1280_v11 }
  0x44   : > { %408 = vperm.xlu1 %1086, %v341_v3   ;;  %436 = vperm.xlu0 %1090, %v341_v3  }
  0x45   : > { %1087 = vset.pattern.permute.xlu2 %v1281_v12 }
  0x46   : > { %415 = vperm.xlu2 %1087, %v341_v3  }
  0x4c   : > { %1088 = vset.pattern.permute.xlu1 %v1282_v13  ;;  %1094 = vset.pattern.permute.xlu0 %v1271_v1  ;;  %v973_v13 = vld [vmem:[#allocation5 + $0x8] sm:$0xff] }
  0x4d   : > { %422 = vperm.xlu1 %1088, %v341_v3  }
  0x4e   : > { %1089 = vset.pattern.permute.xlu2 %v1283_v14 }
  0x4f   : > { %429 = vperm.xlu2 %1089, %v341_v3  }
  0x55   : > { %1091 = vset.pattern.permute.xlu1 %v1284_v15 }
  0x56   : > { %443 = vperm.xlu1 %1091, %v341_v3  }
  0x57   : > { %1092 = vset.pattern.permute.xlu2 %v1285_v16 }
  0x58   : > { %450 = vperm.xlu2 %1092, %v341_v3   ;;  %v975_v3 = vld [vmem:[#allocation5 + $0x18] sm:$0xff] }
  0x59   : > { %615 = vmatpush.bf16.msra.mxu1 %v975_v3 }
  0x5d   : > { %616 = vmatpush.bf16.msra.mxu1 %v974_v9 }
  0x5e   : > { %1093 = vset.pattern.permute.xlu1 %v1271_v1 }
  0x5f   : > { %538 = vperm.xlu1 %1093, %v1098_v59  }
  0x61   : > { %617 = vmatpush.bf16.msra.mxu1 %v973_v13 }
  0x65   : > { %618 = vmatpush.bf16.msra.mxu1 %v972_v21 }
  0x84   : > { %v374_v18 = vpop.permute.xlu2 %373 }
  0x85   : > { %vm375_vm4 = vcmp.eq.s32.totalorder %v374_v18, %v1423_v26 }
  0x86   : > { %v852_v42 = vsel %vm375_vm4, 1.0, %v1286_v28 }
  0x8e   : > { %v381_v25 = vpop.permute.xlu2 %380 }
  0x8f   : > { %vm382_vm5 = vcmp.eq.s32.totalorder %v381_v25, %v1423_v26  ;;  %v984_v25 = vld [vmem:[#allocation7 + $0x20] sm:$0xff] }
  0x90   : > { %v853_v45 = vsel %vm382_vm5, 1.0, %v1286_v28 }
  0x97   : > { %v395_v34 = vpop.permute.xlu2 %394 }
  0x98   : > { %vm396_vm7 = vcmp.eq.s32.totalorder %v395_v34, %v1423_v26  ;;  %v980_v34 = vld [vmem:[#allocation7] sm:$0xff] }
  0x99   : > { %v855_v53 = vsel %vm396_vm7, 1.0, %v1286_v28 }
  0x9b   : > { %v360_v22 = vpop.permute.xlu1 %359  ;;  %v346_v23 = vpop.permute.xlu0 %345 }
  0x9c   : > { %vm347_vm0 = vcmp.eq.s32.totalorder %v346_v23, %v1423_v26  ;;  %vm361_vm1 = vcmp.eq.s32.totalorder %v360_v22, %v1423_v26  ;;  %v987_v22 = vld [vmem:[#allocation7 + $0x38] sm:$0xff]  ;;  %v986_v23 = vld [vmem:[#allocation7 + $0x30] sm:$0xff] }
  0x9d   : > { %v848_v29 = vsel %vm347_vm0, 1.0, %v1286_v28  ;;  %v850_v36 = vsel %vm361_vm1, 1.0, %v1286_v28  ;;  %694 = vmatpush.bf16.msra.mxu2 %v987_v22 }
  0xa0   : > { %v416_v48 = vpop.permute.xlu2 %415 }
  0xa1   : > { %vm417_vm10 = vcmp.eq.s32.totalorder %v416_v48, %v1423_v26  ;;  %695 = vmatpush.bf16.msra.mxu2 %v986_v23 }
  0xa2   : > { %v858_v1 = vsel %vm417_vm10, 1.0, %v1286_v28 }
  0xa4   : > { %v367_v30 = vpop.permute.xlu1 %366  ;;  %v353_v31 = vpop.permute.xlu0 %352 }
  0xa5   : > { %vm354_vm2 = vcmp.eq.s32.totalorder %v353_v31, %v1423_v26  ;;  %vm368_vm3 = vcmp.eq.s32.totalorder %v367_v30, %v1423_v26  ;;  %696 = vmatpush.bf16.msra.mxu2 %v985_v24 }
  0xa6   : > { %v849_v33 = vsel %vm354_vm2, 1.0, %v1286_v28  ;;  %v851_v39 = vsel %vm368_vm3, 1.0, %v1286_v28 }
  0xa7   : > { %v357_v35 = vadd.f32 %v849_v33, %v848_v29  ;;  %v981_v33 = vld [vmem:[#allocation7 + $0x8] sm:$0xff] }
  0xa9   : > { %v364_v38 = vadd.f32 %v850_v36, %v357_v35  ;;  %v430_v62 = vpop.permute.xlu2 %429  ;;  %697 = vmatpush.bf16.msra.mxu2 %v984_v25  ;;  %v1095_v35 = vld [vmem:[%s1504_s4] ss:$0 sm:$0xff] }
  0xaa   : > { %vm431_vm11 = vcmp.eq.s32.totalorder %v430_v62, %v1423_v26 }
  0xab   : > { %v371_v40 = vadd.f32 %v851_v39, %v364_v38  ;;  %v860_v8 = vsel %vm431_vm11, 1.0, %v1286_v28 }
  0xad   : > { %v378_v43 = vadd.f32 %v852_v42, %v371_v40  ;;  %v388_v44 = vpop.permute.xlu1 %387  ;;  %v402_v49 = vpop.permute.xlu0 %401 }
  0xae   : > { %vm389_vm6 = vcmp.eq.s32.totalorder %v388_v44, %v1423_v26  ;;  %vm403_vm8 = vcmp.eq.s32.totalorder %v402_v49, %v1423_v26 }
  0xaf   : > { %v385_v46 = vadd.f32 %v853_v45, %v378_v43  ;;  %v854_v47 = vsel %vm389_vm6, 1.0, %v1286_v28  ;;  %v856_v57 = vsel %vm403_vm8, 1.0, %v1286_v28 }
  0xb1   : > { %v392_v52 = vadd.f32 %v854_v47, %v385_v46 }
  0xb2   : > { %v451_v10 = vpop.permute.xlu2 %450 }
  0xb3   : > { %v399_v55 = vadd.f32 %v855_v53, %v392_v52  ;;  %vm452_vm14 = vcmp.eq.s32.totalorder %v451_v10, %v1423_v26 }
  0xb4   : > { %v863_v17 = vsel %vm452_vm14, 1.0, %v1286_v28 }
  0xb5   : > { %v406_v61 = vadd.f32 %v856_v57, %v399_v55 }
  0xb6   : > { %v409_v56 = vpop.permute.xlu1 %408  ;;  %v437_v5 = vpop.permute.xlu0 %436 }
  0xb7   : > { %vm410_vm9 = vcmp.eq.s32.totalorder %v409_v56, %v1423_v26  ;;  %vm438_vm13 = vcmp.eq.s32.totalorder %v437_v5, %v1423_v26 }
  0xb8   : > { %v857_v60 = vsel %vm410_vm9, 1.0, %v1286_v28  ;;  %v861_v12 = vsel %vm438_vm13, 1.0, %v1286_v28 }
  0xb9   : > { %v413_v0 = vadd.f32 %v857_v60, %v406_v61 }
  0xbb   : > { %v420_v4 = vadd.f32 %v858_v1, %v413_v0 }
  0xbf   : > { %v423_v2 = vpop.permute.xlu1 %422 }
  0xc0   : > { %vm424_vm12 = vcmp.eq.s32.totalorder %v423_v2, %v1423_v26 }
  0xc1   : > { %v859_v6 = vsel %vm424_vm12, 1.0, %v1286_v28 }
  0xc2   : > { %v427_v7 = vadd.f32 %v859_v6, %v420_v4 }
  0xc4   : > { %v434_v11 = vadd.f32 %v860_v8, %v427_v7 }
  0xc6   : > { %v441_v15 = vadd.f32 %v861_v12, %v434_v11 }
  0xc8   : > { %v444_v14 = vpop.permute.xlu1 %443 }
  0xc9   : > { %vm445_vm15 = vcmp.eq.s32.totalorder %v444_v14, %v1423_v26  ;;  %v983_v26 = vld [vmem:[#allocation7 + $0x18] sm:$0xff] }
  0xca   : > { %v862_v16 = vsel %vm445_vm15, 1.0, %v1286_v28  ;;  %698 = vmatpush.bf16.msra.mxu2 %v983_v26 }
  0xcb   : > { %v448_v18 = vadd.f32 %v862_v16, %v441_v15 }
  0xcd   : > { %v455_v19 = vadd.f32 %v863_v17, %v448_v18 }
  0xce   : > { %699 = vmatpush.bf16.msra.mxu2 %v982_v27 }
  0xcf   : > { %v456_v20 = vpack.c.bf16 %v455_v19, %v455_v19 }
  0xd1   : > { %529 = vmatmul.bf16.vlgmr.msra.gmra.mxu0 %v456_v20  ;;  %v539_v29 = vpop.permute.xlu1 %538 }
  0xd2   : > { %700 = vmatpush.bf16.msra.mxu2 %v981_v33 }
  0xd6   : > { %701 = vmatpush.bf16.msra.mxu2 %v980_v34 }
 0x14e   : > { %v530_v28 = vpop.f32.mrf.mxu0 }
 0x14f   : > { %v541_v30 = vmul.f32 %v539_v29, %v530_v28 }
 0x151   : > { %v542_v31 = vpack.c.bf16 %v541_v30, %v541_v30 }
 0x153   : > { %619 = vmatmul.bf16.vlgmr.msra.gmra.mxu1 %v542_v31 }
 0x156   : > { %v532_v32 = vpop.f32.mrf.mxu0 }
 0x1d0   : > { %v620_v36 = vpop.f32.mrf.mxu1 }
 0x1d1   : > { %v621_v37 = vadd.f32 %v1095_v35, %v620_v36 }
 0x1d3   : > { %v624_v38 = vmax.f32 %v621_v37, 0.0 }
 0x1d5   : > { %v625_v39 = vpack.c.bf16 %v624_v38, %v624_v38 }
 0x1d7   : > { %702 = vmatmul.bf16.vlgmr.msra.gmra.mxu2 %v625_v39 }
 0x1d8   : > { %v622_v40 = vpop.f32.mrf.mxu1 }
 0x25a   : > { %v703_v42 = vpop.f32.mrf.mxu2 }
 0x25b   : > { %v704_v43 = vadd.f32 %v1096_v41, %v703_v42 }
 0x25d   : > { %707 = vmax.xlane.f32.xlu2 %v704_v43 }
 0x262   : > { %v705_v44 = vpop.f32.mrf.mxu2 }
 0x2d0   : > { %v708_v45 = vpop.xlane.xlu2 %707 }
 0x2d1   : > { %v709_v46 = vsub.f32 %v704_v43, %v708_v45 }
 0x2d3   : > { %v710_v47 = vmul.f32 1.442695, %v709_v46 }
 0x2d5   : > { %1099 = vpow2.f32 %v710_v47 }
 0x2db   : > { %v1100_v48 = vpop.eup %1099 }
 0x2dc   : > { %712 = vadd.xlane.f32.xlu0 %v1100_v48 }
 0x34f   : > { %v713_v49 = vpop.xlane.xlu0 %712 }
 0x350   : > { %1101 = vrcp.f32 %v713_v49 }
 0x356   : > { %v1102_v50 = vpop.eup %1101 }
 0x357   : > { %v715_v51 = vmul.f32 %v1102_v50, %v1100_v48 }
 0x359   : > { %716 = vst [vmem:[%s332_s19] sm:$0xff] %v715_v51 }
 0x35a   : > { %1220 = shalt.err (!%p1217_p8)
}
 0x35b   : > { %1000 = dma.vmem_to_hbm [thread:$0]  (%p1365_p5), %s731_s20, 128, %s733_s21, %s718_s22  }
 0x35c PF: > { %p1022_p9 = scmp.ge.s32.totalorder %s1263_s27, 2  ;;  %s744_s15 = sand.u32 1, %s1251_s24  }
 0x35d   : > { %s745_s18 = scalar_lea.sflag [#allocation4], %s744_s15 }
 0x35e   : > { %p1013_p10 = pnand %p1022_p9, %p1369_p6 }
 0x360   : > { %p1014_p11 = pneg %p1013_p10 }
 0x362   : > { %1246 = dma.done.wait (%p1014_p11), %s745_s18, 128  }
 0x363   : > { %1248 = vsyncadd (%p1014_p11), %s745_s18, 4294967168  ;;  %p19_p12 = scmp.ge.s32.totalorder %s1352_s30, 4   ;;  %s1514_s24 = smov %s1255_s25 }
 0x364   : > { %s1515_s25 = smov %s1259_s26  ;;  %s1516_s26 = smov %s1363_s10 }
 0x365   : > { %s1517_s27 = smov %s1352_s30  ;;  %21 = sbr.rel (!%p19_p12) target bundleno = 7 (0x7), region = 99 }
 0x36a   :  { %751 = vsyncpa [#allocation3], 1 }
 0x36b   :  { %753 = vsyncpa [#allocation3 + $0x1], 1 }
 0x36c   :  { %754 = vsyncpa [#allocation6], 1 }
 0x36d   :  { %755 = vsyncpa [#allocation4], 1 }
 0x36e   :  { %757 = vsyncpa [#allocation4 + $0x1], 1 }

</bundles_post_ra>
